<compile_context>
chip_gen: v7x
topology: tpu7x:2x2x1
jax: 0.10.0
libtpu: 0.0.40
codegen_flags: <defaults>
</compile_context>

<pallas_src>
import functools

import jax
import jax.numpy as jnp
from jax.experimental import pallas as pl
from jax.experimental.pallas import tpu as pltpu


def _accuracy_kernel(y_pr_ref, out_ref, *, num_classes, hw, rows_per_tile,
                     mask_tail):
    """One (1, C, rows, 128) logits tile -> (1, 1, 1, 128) lane-partial tp."""
    C = num_classes

    # Predicate-form argmax with first-occurrence tie-break (== torch/jnp argmax):
    #   argmax == 0  <=>  x0 >= max(x[1:])
    #   argmax == 1  <=>  x1 >  x0  and  x1 >= max(x[2:])
    # Class rows are read directly from the ref (no full (C, rows, 128) temp).
    x0 = y_pr_ref[0, 0]                       # (rows, 128)
    x1 = y_pr_ref[0, 1]
    if C == 2:
        m_rest = x1
        is1 = x1 > x0
    else:
        m_ge2 = y_pr_ref[0, 2]
        for c in range(3, C):
            m_ge2 = jnp.maximum(m_ge2, y_pr_ref[0, c])
        m_rest = jnp.maximum(x1, m_ge2)
        is1 = (x1 > x0) & (x1 >= m_ge2)
    is0 = x0 >= m_rest

    # Closed-form per-pixel tp: (C-1) if argmax==0, 1 if argmax==1, else 0.
    tp = (jnp.float32(C - 1) * is0.astype(jnp.float32)
          + is1.astype(jnp.float32))          # (rows, 128)

    if mask_tail:
        # Zero contributions from wrapper lane-padding / Pallas tail-block padding.
        t = pl.program_id(1)
        row = jax.lax.broadcasted_iota(jnp.int32, tp.shape, 0)
        lane = jax.lax.broadcasted_iota(jnp.int32, tp.shape, 1)
        idx = (t * rows_per_tile + row) * 128 + lane
        tp = jnp.where(idx < hw, tp, jnp.float32(0.0))

    # Lane-shaped partial (sublane-only reduce).  The cross-lane reduction and
    # the division by N*C*H*W happen once, outside the kernel.
    out_ref[...] = jnp.sum(tp, axis=0, keepdims=True).reshape(1, 1, 1, 128)


def accuracy_pallas(y_pr, y_gt, class_index=0):
    """Pallas equivalent of Accuracy(class_index)(y_pr, y_gt)."""
    # NOTE: for valid labels (0 <= y_gt < C, required by the torch.eye indexing
    # in the reference) the score is independent of y_gt, so the kernel does not
    # read it.  class_index is unused by the reference forward as well.
    del y_gt, class_index
    N, C, H, W = y_pr.shape
    hw = H * W
    total = N * C * H * W

    if C < 2:
        # C == 1: one-hot == [1.0], argmax value == 0 -> zero matches -> score 0.
        return jnp.float32(0.0)

    # Lane-dense layout: (N, C, H, W) -> (N, C, hw_pad//128, 128).  The reshape
    # of contiguous trailing dims is free; padding only happens when hw % 128 != 0.
    hw_pad = -(-hw // 128) * 128
    x = y_pr.reshape(N, C, hw)
    if hw_pad != hw:
        x = jnp.pad(x, ((0, 0), (0, 0), (0, hw_pad - hw)))
    s_total = hw_pad // 128
    x = x.reshape(N, C, s_total, 128)

    # ~2 MiB logits block per grid step (double-buffered by Pallas) -- well
    # within the default scoped-VMEM budget on v5e (16 MiB) / v6e / v7x (32 MiB).
    target_rows = max(8, (2 * 1024 * 1024) // (C * 128 * 4))
    if s_total <= target_rows:
        rows = s_total                      # full dim -> always a legal block
    else:
        rows = (target_rows // 8) * 8       # multiple of 8 sublanes
    num_tiles = -(-s_total // rows)
    mask_tail = (hw_pad != hw) or (rows * num_tiles != s_total)

    kernel = functools.partial(
        _accuracy_kernel,
        num_classes=C,
        hw=hw,
        rows_per_tile=rows,
        mask_tail=mask_tail,
    )

    partials = pl.pallas_call(
        kernel,
        out_shape=jax.ShapeDtypeStruct((N, num_tiles, 1, 128), jnp.float32),
        grid_spec=pltpu.PrefetchScalarGridSpec(
            num_scalar_prefetch=0,
            grid=(N, num_tiles),
            in_specs=[
                pl.BlockSpec((1, C, rows, 128), lambda n, t: (n, 0, t, 0)),
            ],
            out_specs=pl.BlockSpec((1, 1, 1, 128), lambda n, t: (n, t, 0, 0)),
        ),
        compiler_params=pltpu.CompilerParams(
            # Every grid step owns its output block -> no accumulation, both
            # axes can be sharded across TensorCores (2x on v7x, no-op on v5e/v6e).
            dimension_semantics=("parallel", "parallel"),
        ),
    )(x)

    return jnp.sum(partials) / jnp.float32(total)


def _accuracy_ref(y_pr, y_gt):
    """Pure-JAX reference mirroring the PyTorch forward exactly."""
    num_classes = y_pr.shape[1]
    true_1_hot = jnp.eye(num_classes, dtype=jnp.float32)[
        jnp.squeeze(y_gt, axis=1).astype(jnp.int32)
    ]                                                     # (N, H, W, C)
    true_1_hot = jnp.transpose(true_1_hot, (0, 3, 1, 2))  # (N, C, H, W)
    probs = jax.nn.softmax(y_pr.astype(jnp.float32), axis=1)
    am = jnp.argmax(probs, axis=1)[:, None]               # (N, 1, H, W)
    tp = jnp.sum(true_1_hot == am.astype(jnp.float32))
    return tp / true_1_hot.size


if __name__ == "__main__":
    key = jax.random.PRNGKey(0)
    k1, k2 = jax.random.split(key)

    N, C, H, W = 2, 4, 16, 16
    y_pr = jax.random.normal(k1, (N, C, H, W), dtype=jnp.float32)
    y_gt = jax.random.randint(k2, (N, 1, H, W), 0, C, dtype=jnp.int32)

    score = accuracy_pallas(y_pr, y_gt, class_index=0)
    score = jax.block_until_ready(score)

    ref = _accuracy_ref(y_pr, y_gt)
    assert jnp.allclose(score, ref, atol=1e-6), (score, ref)

    print("KERNEL_OK")
</pallas_src>

<mosaic_0001>
module attributes {stable_mosaic.version = 11 : i64} {
  func.func @_accuracy_kernel(%arg0: i32, %arg1: i32, %arg2: memref<1x4x2x128xf32, #tpu.memory_space<vmem>>, %arg3: memref<1x1x1x128xf32, #tpu.memory_space<vmem>>) attributes {dimension_semantics = [#tpu.dimension_semantics<parallel>, #tpu.dimension_semantics<parallel>], iteration_bounds = array<i64: 2, 1>, scalar_prefetch = 0 : i64, scratch_operands = 0 : i64, tpu.core_type = #tpu.core_type<tc>, window_params = [{transform_indices = @transform_0, window_bounds = array<i64: 1, 4, 2, 128>}, {transform_indices = @transform_1, window_bounds = array<i64: 1, 1, 1, 128>}]} {
    %c0 = arith.constant 0 : index
    %c0_0 = arith.constant 0 : index
    %c0_1 = arith.constant 0 : index
    %c0_2 = arith.constant 0 : index
    %0 = vector.load %arg2[%c0, %c0_0, %c0_1, %c0_2] : memref<1x4x2x128xf32, #tpu.memory_space<vmem>>, vector<1x1x2x128xf32>
    %1 = vector.shape_cast %0 : vector<1x1x2x128xf32> to vector<2x128xf32>
    %c0_3 = arith.constant 0 : index
    %c1 = arith.constant 1 : index
    %c0_4 = arith.constant 0 : index
    %c0_5 = arith.constant 0 : index
    %2 = vector.load %arg2[%c0_3, %c1, %c0_4, %c0_5] : memref<1x4x2x128xf32, #tpu.memory_space<vmem>>, vector<1x1x2x128xf32>
    %3 = vector.shape_cast %2 : vector<1x1x2x128xf32> to vector<2x128xf32>
    %c0_6 = arith.constant 0 : index
    %c2 = arith.constant 2 : index
    %c0_7 = arith.constant 0 : index
    %c0_8 = arith.constant 0 : index
    %4 = vector.load %arg2[%c0_6, %c2, %c0_7, %c0_8] : memref<1x4x2x128xf32, #tpu.memory_space<vmem>>, vector<1x1x2x128xf32>
    %5 = vector.shape_cast %4 : vector<1x1x2x128xf32> to vector<2x128xf32>
    %c0_9 = arith.constant 0 : index
    %c3 = arith.constant 3 : index
    %c0_10 = arith.constant 0 : index
    %c0_11 = arith.constant 0 : index
    %6 = vector.load %arg2[%c0_9, %c3, %c0_10, %c0_11] : memref<1x4x2x128xf32, #tpu.memory_space<vmem>>, vector<1x1x2x128xf32>
    %7 = vector.shape_cast %6 : vector<1x1x2x128xf32> to vector<2x128xf32>
    %8 = arith.maximumf %5, %7 : vector<2x128xf32>
    %9 = arith.maximumf %3, %8 : vector<2x128xf32>
    %10 = arith.cmpf ogt, %3, %1 : vector<2x128xf32>
    %11 = arith.cmpf oge, %3, %8 : vector<2x128xf32>
    %12 = arith.andi %10, %11 : vector<2x128xi1>
    %13 = arith.cmpf oge, %1, %9 : vector<2x128xf32>
    %14 = arith.extui %13 : vector<2x128xi1> to vector<2x128xi32>
    %15 = arith.sitofp %14 : vector<2x128xi32> to vector<2x128xf32>
    %cst = arith.constant 3.000000e+00 : f32
    %16 = vector.broadcast %cst : f32 to vector<2x128xf32>
    %17 = arith.mulf %16, %15 : vector<2x128xf32>
    %18 = arith.extui %12 : vector<2x128xi1> to vector<2x128xi32>
    %19 = arith.sitofp %18 : vector<2x128xi32> to vector<2x128xf32>
    %20 = arith.addf %17, %19 : vector<2x128xf32>
    %cst_12 = arith.constant dense<0.000000e+00> : vector<128xf32>
    %21 = vector.multi_reduction <add>, %20, %cst_12 [0] : vector<2x128xf32> to vector<128xf32>
    %22 = vector.shape_cast %21 : vector<128xf32> to vector<1x128xf32>
    %23 = vector.shape_cast %22 : vector<1x128xf32> to vector<1x1x1x128xf32>
    %c0_13 = arith.constant 0 : index
    %c0_14 = arith.constant 0 : index
    %c0_15 = arith.constant 0 : index
    %c0_16 = arith.constant 0 : index
    %24 = vector.load %arg3[%c0_13, %c0_14, %c0_15, %c0_16] : memref<1x1x1x128xf32, #tpu.memory_space<vmem>>, vector<1x1x1x128xf32>
    tpu.vector_store %arg3[%c0_13, %c0_14, %c0_15, %c0_16], %23 {strides = array<i32>} : memref<1x1x1x128xf32, #tpu.memory_space<vmem>>, vector<1x1x1x128xf32>,
    return
  }
  func.func @transform_0(%arg0: i32, %arg1: i32) -> (i32, i32, i32, i32) {
    %c0_i32 = arith.constant 0 : i32
    %c0_i32_0 = arith.constant 0 : i32
    %c0_i32_1 = arith.constant 0 : i32
    return %arg0, %c0_i32, %arg1, %c0_i32_0 : i32, i32, i32, i32
  }
  func.func @transform_1(%arg0: i32, %arg1: i32) -> (i32, i32, i32, i32) {
    %c0_i32 = arith.constant 0 : i32
    %c0_i32_0 = arith.constant 0 : i32
    %c0_i32_1 = arith.constant 0 : i32
    return %arg0, %arg1, %c0_i32, %c0_i32_0 : i32, i32, i32, i32
  }
}

</mosaic_0001>

<bundles_post_ra>
// kernel: tpu_custom_call.1
= control target key start
LH: loop header
LB: loop body
LE: loop exit
PB: predicated region body
PF: predicated region fallthrough
CT: control target
= control target key end

     0   :  { %6 = vsyncpa [#allocation3], 0  ;;  %s656_s0 = inlined_call_operand.hbm [shape: f32[2,4,2,128], index: 0, kind: input, shape index: {}]   ;;  %s657_s1 = inlined_call_operand.hbm [shape: f32[2,1,1,128], index: 1, kind: output, shape index: {}]  }
   0x1   :  { %8 = vsyncpa [#allocation3 + $0x1], 0 }
   0x2   :  { %9 = vsyncpa [#allocation4], 0 }
   0x3   :  { %11 = vsyncpa [#allocation4 + $0x1], 0  ;;  %s482_s6 = smov 0   ;;  %s484_s7 = smov 0  }
   0x4   :  { %s486_s8 = smov 0   ;;  %s488_s9 = smov 0  }
   0x5   :  { %s490_s10 = smov 0   ;;  %s492_s11 = smov 0  }
   0x6 LB: > { %s270_s12 = sadd.s32 4294967295, %s465_s11   ;;  %s271_s13 = sadd.s32 4294967294, %s465_s11   ;;  %s465_s11 = sphi %s492_s11, %s17_s11   ;;  %s461_s10 = sphi %s490_s10, %s672_s10   ;;  %s457_s9 = sphi %s488_s9, %s671_s9   ;;  %s453_s8 = sphi %s486_s8, %s670_s8   ;;  %s449_s7 = sphi %s484_s7, %s669_s7   ;;  %s445_s6 = sphi %s482_s6, %s668_s6  }
   0x7   : > { %s29_s14 = sadd.s32 1, %s461_s10  ;;  %s38_s15 = sadd.s32 1, %s453_s8 }
   0x8   : > { %p31_p0 = scmp.ge.s32.totalorder %s29_s14, 2  ;;  %p45_p1 = scmp.ne.s32.totalorder %s453_s8, %s449_s7 }
   0x9   : > { %p46_p2 = scmp.eq.s32.totalorder %s465_s11, 0  ;;  %p51_p3 = scmp.ne.s32.totalorder %s449_s7, %s445_s6 }
   0xa   : > { %s674_s14 = smov (%p31_p0, %s29_s14), 0  ;;  %p52_p5 = scmp.eq.s32.totalorder %s270_s12, 0 }
   0xb   : > { %p523_p4 = por %p46_p2, %p45_p1  ;;  %s33_s17 = ssub.s32 %s461_s10, %s674_s14 }
   0xc   : > { %p77_p6 = scmp.eq.s32.totalorder %s270_s12, 1  ;;  %p36_p7 = scmp.eq.s32.totalorder %s33_s17, 0 }
   0xd   : > { %p529_p8 = por %p52_p5, %p51_p3  ;;  %p83_p10 = scmp.eq.s32.totalorder %s271_s13, 1 }
   0xe   : > { %p533_p9 = por %p77_p6, %p45_p1  ;;  %p300_p13 = scmp.lt.s32.totalorder %s465_s11, 2 }
   0xf   : > { %s538_s20 = scalar_select %p36_p7, %s453_s8, %s38_s15  }
  0x10   : > { %s661_s19 = scalar_select %p533_p9, 1, 0 }
  0x11   : > { %p540_p11 = por %p83_p10, %p51_p3  ;;  %s103_s22 = sand.u32 1, %s453_s8  }
  0x12   : > { %s274_s23 = sshll.u32 %s103_s22, 3  ;;  %s287_s24 = sshll.u32 %s461_s10, 7 }
  0x13   : > { %s662_s21 = scalar_select %p540_p11, 1, 0 }
  0x14   : > { %s551_s27 = scalar_lea.hbm %s656_s0, %s287_s24  ;;  %s107_s28 = scalar_lea.vmem [#allocation2], %s274_s23 }
  0x15   : > { %s115_s29 = sshll.u32 %s107_s28, 4  ;;  %p557_p0 = pnand %p300_p13, %p523_p4  ;;  %s553_s29 = int_to_ptr.vmem [resolvable:$true] %s115_s29 }
  0x16   : > { %s562_s2 = scalar_lea.sflag [#allocation3], %s103_s22  ;;  %s353_s3 = scalar_lea.hbm %s551_s27, 128 }
  0x17   : > { %p354_p2 = scmp.ne.s32.totalorder %s551_s27, %s353_s3  ;;  %p355_p3 = pneg %p557_p0 }
  0x18   : > { %s358_s12 = scalar_lea.hbm %s656_s0, 256  ;;  %p359_p4 = scmp.lt.u32.totalorder %s551_s27, %s656_s0 }
  0x19   : > { %p356_p5 = pnand %p355_p3, %p354_p2  ;;  %p360_p7 = scmp.lt.u32.totalorder %s358_s12, %s353_s3 }
  0x1a   : > { %p362_p13 = scmp.lt.u32.totalorder %s353_s3, %s551_s27 }
  0x1b   : > { %p357_p6 = pneg %p356_p5  ;;  %p361_p10 = por %p360_p7, %p359_p4 }
  0x1d   : > { %p363_p12 = por %p362_p13, %p361_p10 }
  0x1f   : > { %p364_p1 = pnand %p363_p12, %p357_p6 }
  0x21   : > { %367 = shalt.err (!%p364_p1)
}
  0x22   : > { %s368_s16 = scalar_lea.vmem %s553_s29, 128  ;;  %s467_s17 = smov [#allocation2]  }
  0x23   : > { %p369_p2 = scmp.ne.s32.totalorder %s553_s29, %s368_s16  ;;  %s373_s22 = sshll.u32 %s467_s17, 4  ;;  %s374_s22 = int_to_ptr.vmem [resolvable:$false] %s373_s22 }
  0x24   : > { %s375_s23 = scalar_lea.vmem %s374_s22, 256  ;;  %p376_p9 = scmp.lt.s32.totalorder %s553_s29, %s374_s22 }
  0x25   : > { %p371_p5 = pnand %p369_p2, %p355_p3  ;;  %p377_p4 = scmp.lt.s32.totalorder %s375_s23, %s368_s16 }
  0x27   : > { %p372_p11 = pneg %p371_p5  ;;  %p378_p7 = por %p377_p4, %p376_p9 }
  0x29   : > { %p379_p10 = pnand %p378_p7, %p372_p11 }
  0x2b   : > { %382 = shalt.err (!%p379_p10)
}
  0x2c   : > { %s468_s24 = smov 32   ;;  %s469_s25 = smov 2  }
  0x2d   : > { %295 = dma.hbm_to_vmem [thread:$0]  (!%p557_p0), %s551_s27, 128, %s553_s29, %s562_s2, %s468_s24, %s468_s24, %s469_s25  }
  0x2e   : > { %p123_p12 = scmp.lt.s32.totalorder %s465_s11, 3  ;;  %p664_p1 = scmp.ge.s32.totalorder %s465_s11, 1 }
  0x30   : > { %p124_p3 = pnand %p664_p1, %p123_p12 }
  0x31   : > { %s594_s26 = sand.u32 (!%p124_p3), 1, %s449_s7  }
  0x32   : > { %127 = sbr.rel (%p124_p3) target bundleno = 97 (0x61), region = 24  ;;  %s278_s28 = sshll.u32 (!%p124_p3), %s594_s26, 3 }
  0x33   : > { %s130_s3 = scalar_lea.sflag (!%p124_p3), [#allocation3], %s594_s26  ;;  %s133_s4 = scalar_lea.vmem (!%p124_p3), [#allocation2], %s278_s28 }
  0x39   : > { %436 = dma.done.wait (%p529_p8), %s130_s3, 128  }
  0x3a   : > { %438 = vsyncadd (%p529_p8), %s130_s3, 4294967168  ;;  %v151_v0 = vld [vmem:[%s133_s4] sm:$0x3]  ;;  %v280_v1 = vld [vmem:[%s133_s4 + $0x4] sm:$0x3]  ;;  %v470_v6 = vmov 0.0  }
  0x3b   : > { %v279_v2 = vld [vmem:[%s133_s4 + $0x2] sm:$0x3]  ;;  %v281_v3 = vld [vmem:[%s133_s4 + $0x6] sm:$0x3]  ;;  %vm170_vm4 = vcmask 1041408   ;;  %s150_s18 = scalar_lea.vmem [#allocation5], %s594_s26 }
  0x3c   : > { %v158_v4 = vmax.f32 %v280_v1, %v281_v3  ;;  %vm160_vm0 = vcmp.gt.f32.partialorder %v279_v2, %v151_v0  ;;  %s193_s27 = sshll.u32 %s150_s18, 4  ;;  %s284_s29 = sshll.u32 %s457_s9, 4  ;;  %s604_s27 = int_to_ptr.vmem [resolvable:$true] %s193_s27 }
  0x3d   : > { %s609_s5 = scalar_lea.hbm %s657_s1, %s284_s29  ;;  %s180_s12 = scalar_lea.sflag [#allocation4], %s594_s26 }
  0x3e   : > { %v159_v5 = vmax.f32 %v279_v2, %v158_v4  ;;  %vm161_vm1 = vcmp.ge.f32.partialorder %v279_v2, %v158_v4  ;;  %s383_s13 = scalar_lea.vmem %s604_s27, 16  ;;  %p665_p9 = scmp.ne.s32.totalorder %s661_s19, 0 }
  0x3f   : > { %vm162_vm2 = vmand %vm160_vm0, %vm161_vm1  ;;  %p384_p8 = scmp.ne.s32.totalorder %s604_s27, %s383_s13  ;;  %s471_s9 = smov [#allocation5]  }
  0x40   : > { %vm163_vm3 = vcmp.ge.f32.partialorder %v151_v0, %v159_v5  ;;  %v283_v8 = vsel %vm162_vm2, 1.0, %v470_v6  ;;  %s387_s15 = sshll.u32 %s471_s9, 4  ;;  %s388_s15 = int_to_ptr.vmem [resolvable:$false] %s387_s15 }
  0x41   : > { %v282_v7 = vsel %vm163_vm3, 1.0, %v470_v6  ;;  %p385_p11 = pnand %p384_p8, %p665_p9  ;;  %s389_s16 = scalar_lea.vmem %s388_s15, 32 }
  0x42   : > { %v166_v9 = vmul.f32 3.0, %v282_v7  ;;  %p390_p6 = scmp.lt.s32.totalorder %s604_s27, %s388_s15  ;;  %p391_p13 = scmp.lt.s32.totalorder %s389_s16, %s383_s13 }
  0x43   : > { %p386_p0 = pneg %p385_p11 }
  0x44   : > { %v169_v10 = vadd.f32 %v283_v8, %v166_v9  ;;  %p392_p2 = por %p391_p13, %p390_p6 }
  0x46   : > { %v171_v11 = vsel %vm170_vm4, %v169_v10, 0.0  ;;  %p393_p5 = pnand %p392_p2, %p386_p0 }
  0x47   : > { %v172_v12 = vrot.slane %v171_v11, 4 }
  0x49   : > { %v173_v13 = vadd.f32 %v172_v12, %v171_v11 }
  0x4b   : > { %v174_v14 = vrot.slane %v173_v13, 2 }
  0x4d   : > { %v175_v15 = vadd.f32 %v174_v14, %v173_v13 }
  0x4f   : > { %v176_v16 = vrot.slane %v175_v15, 1 }
  0x51   : > { %v177_v17 = vadd.f32 %v176_v16, %v175_v15 }
  0x53   : > { %178 = vst [vmem:[%s150_s18] sm:$0x1] %v177_v17 }
  0x54   : > { %396 = shalt.err (!%p393_p5)
}
  0x55   : > { %s397_s17 = scalar_lea.hbm %s609_s5, 16  ;;  %s401_s24 = scalar_lea.hbm %s657_s1, 32 }
  0x56   : > { %p398_p4 = scmp.ne.s32.totalorder %s609_s5, %s397_s17  ;;  %p402_p12 = scmp.lt.u32.totalorder %s609_s5, %s657_s1 }
  0x57   : > { %p403_p1 = scmp.lt.u32.totalorder %s401_s24, %s397_s17  ;;  %p405_p8 = scmp.lt.u32.totalorder %s397_s17, %s609_s5 }
  0x58   : > { %p399_p7 = pnand %p398_p4, %p665_p9 }
  0x59   : > { %p404_p3 = por %p403_p1, %p402_p12 }
  0x5a   : > { %p400_p10 = pneg %p399_p7 }
  0x5b   : > { %p406_p11 = por %p405_p8, %p404_p3 }
  0x5d   : > { %p407_p0 = pnand %p406_p11, %p400_p10 }
  0x5f   : > { %410 = shalt.err (!%p407_p0)
}
  0x60   : > { %290 = dma.vmem_to_hbm [thread:$0]  (%p665_p9), %s604_s27, 16, %s609_s5, %s180_s12  }
  0x61 PF: > { %s205_s28 = sand.u32 1, %s445_s6   ;;  %p666_p6 = scmp.ne.s32.totalorder %s662_s21, 0 }
  0x62   : > { %p667_p13 = scmp.ge.s32.totalorder %s465_s11, 2  ;;  %s206_s3 = scalar_lea.sflag [#allocation4], %s205_s28 }
  0x64   : > { %p297_p2 = pnand %p667_p13, %p666_p6 }
  0x66   : > { %440 = dma.done.wait (!%p297_p2), %s206_s3, 16  }
  0x67   : > { %442 = vsyncadd (!%p297_p2), %s206_s3, 4294967280  ;;  %s17_s11 = sadd.s32 1, %s465_s11   ;;  %s668_s6 = smov %s449_s7 }
  0x68   : > { %p14_p5 = scmp.ge.s32.totalorder %s17_s11, 4   ;;  %s669_s7 = smov %s453_s8 }
  0x69   : > { %s670_s8 = smov %s538_s20  ;;  %s671_s9 = smov %s461_s10 }
  0x6a   : > { %s672_s10 = smov %s674_s14  ;;  %16 = sbr.rel (!%p14_p5) target bundleno = 6 (0x6), region = 72 }
  0x71   :  { %210 = vsyncpa [#allocation3], 1 }
  0x72   :  { %212 = vsyncpa [#allocation3 + $0x1], 1 }
  0x73   :  { %213 = vsyncpa [#allocation4], 1 }
  0x74   :  { %215 = vsyncpa [#allocation4 + $0x1], 1 }

</bundles_post_ra>
